<compile_context>
chip_gen: v6e
topology: v6e:2x2x1
jax: 0.10.0
libtpu: 0.0.40
codegen_flags: <defaults>
</compile_context>

<pallas_src>
import jax
import jax.numpy as jnp
from jax import lax
from jax.experimental import pallas as pl
from jax.experimental.pallas import tpu as pltpu


def _make_kernel(seq_len, ts, has_tail):
    """Kernel for one (batch-element, S-tile) grid step."""

    def kernel(x_ref, wt_ref, b_ref, u_ref, o_ref, m_ref, l_ref, acc_ref):
        s_step = pl.program_id(1)

        # ---- init online-softmax state at the first S step of each batch elem
        @pl.when(s_step == 0)
        def _():
            m_ref[...] = jnp.full(m_ref.shape, -jnp.inf, dtype=m_ref.dtype)
            l_ref[...] = jnp.zeros(l_ref.shape, dtype=l_ref.dtype)
            acc_ref[...] = jnp.zeros(acc_ref.shape, dtype=acc_ref.dtype)

        xt = x_ref[...]                                    # (ts, H), native dtype

        if has_tail:
            # Zero out-of-range rows so garbage in the partial last tile can
            # never reach the MXU accumulators (0 * garbage would be NaN).
            base = s_step * ts
            valid_col = (base + lax.broadcasted_iota(jnp.int32, (ts, 1), 0)) < seq_len
            xt = jnp.where(valid_col, xt, jnp.zeros_like(xt))

        # uit^T = tanh(W^T @ x^T + b): (A, ts) -- A on sublanes, rows on lanes.
        uit_t = jnp.tanh(
            lax.dot_general(
                wt_ref[...], xt,
                dimension_numbers=(((1,), (1,)), ((), ())),
                preferred_element_type=jnp.float32,
            )
            + b_ref[...]
        )

        # score row: u . uit  ->  lane-dense (1, ts)
        scores = jnp.sum(uit_t * u_ref[...], axis=0, keepdims=True)

        if has_tail:
            valid_row = (s_step * ts
                         + lax.broadcasted_iota(jnp.int32, (1, ts), 1)) < seq_len
            scores = jnp.where(valid_row, scores, -jnp.inf)

        # ---- flash-style online softmax over the sequence axis --------------
        m_prev = m_ref[...]                                               # (1, 1)
        m_new = jnp.maximum(m_prev, jnp.max(scores, axis=1, keepdims=True))
        alpha = jnp.exp(m_prev - m_new)                                   # (1, 1)
        p = jnp.exp(scores - m_new)                                       # (1, ts)

        l_ref[...] = alpha * l_ref[...] + jnp.sum(p, axis=1, keepdims=True)
        # Weighted row-sum as an MXU matvec: (1, ts) @ (ts, H) -> (1, H), f32 acc.
        acc_ref[...] = alpha * acc_ref[...] + jnp.dot(
            p.astype(xt.dtype), xt, preferred_element_type=jnp.float32)
        m_ref[...] = m_new

        # ---- finalize: normalize, cast, store on the last S step ------------
        @pl.when(s_step == pl.num_programs(1) - 1)
        def _():
            o_ref[...] = (acc_ref[...] / l_ref[...]).astype(o_ref.dtype)

    return kernel


def att_layer2(x, W, b, u, *, block_s=1024, max_block_bytes=4 * 1024 * 1024):
    """Pallas-TPU forward of AttLayer2.  x: (S,B,H), W: (H,A), b: (A,), u: (A,1)."""
    x = jnp.asarray(x)
    W = jnp.asarray(W)
    b = jnp.asarray(b)
    u = jnp.asarray(u)

    S, B, H = x.shape
    A = W.shape[1]
    dtype = x.dtype
    itemsize = jnp.dtype(dtype).itemsize

    # S tile: as large as possible (fewer grid steps, bigger DMAs) while a
    # double-buffered (ts, H) x block stays within a modest VMEM budget.
    ts_cap = max(8, (max_block_bytes // (H * itemsize)) // 8 * 8)
    ts = max(8, (min(block_s, ts_cap) // 8) * 8)
    if S <= ts:
        ts = S                      # single S tile, no tail mask needed
    num_s = -(-S // ts)
    has_tail = (S % ts) != 0

    # Hoisted, tiny parameter prep: cast W once to x.dtype and pre-transpose.
    wt = W.astype(dtype).T          # (A, H)
    b_col = b.astype(jnp.float32).reshape(A, 1)
    u_col = u.astype(jnp.float32).reshape(A, 1)

    # Free reshape: unit dim so the x / out BlockSpecs' last two dims equal the
    # full array dims (no (8,128) divisibility issues, no HBM-side padding).
    x4 = x.reshape(S, B, 1, H)

    grid = (B, num_s)
    kernel = _make_kernel(S, ts, has_tail)

    out = pl.pallas_call(
        kernel,
        out_shape=jax.ShapeDtypeStruct((B, 1, H), dtype),
        grid=grid,
        in_specs=[
            pl.BlockSpec((ts, None, None, H), lambda bi, si: (si, bi, 0, 0)),  # x
            pl.BlockSpec((A, H), lambda bi, si: (0, 0)),                       # W^T
            pl.BlockSpec((A, 1), lambda bi, si: (0, 0)),                       # b
            pl.BlockSpec((A, 1), lambda bi, si: (0, 0)),                       # u
        ],
        out_specs=pl.BlockSpec((None, 1, H), lambda bi, si: (bi, 0, 0)),
        scratch_shapes=[
            pltpu.VMEM((1, 1), jnp.float32),   # running max
            pltpu.VMEM((1, 1), jnp.float32),   # running softmax denominator
            pltpu.VMEM((1, H), jnp.float32),   # running weighted sum
        ],
        compiler_params=pltpu.CompilerParams(
            dimension_semantics=("parallel", "arbitrary"),
        ),
        cost_estimate=pl.CostEstimate(
            flops=2 * S * B * A * (H + 1) + 2 * S * B * H,
            transcendentals=S * B * (A + 1),
            bytes_accessed=itemsize * (S * B * H + B * H) + 4 * (A * H + 2 * A),
        ),
    )(x4, wt, b_col, u_col)

    return out.reshape(B, H)


def att_layer2_ref(x, W, b, u):
    uit = jnp.tanh(jnp.matmul(x, W) + b)
    ait = jnp.squeeze(jnp.matmul(uit, u), -1)
    ait = jnp.exp(ait)
    ait = ait / jnp.sum(ait, axis=0, keepdims=True)
    return jnp.sum(x * ait[..., None], axis=0)


if __name__ == "__main__":
    # Small deterministic shapes: seq=20, batch=4, hiddenDim=32, attentionDim=16.
    S, B, H, A = 20, 4, 32, 16
    key = jax.random.PRNGKey(0)
    kx, kw, kb, ku, kx2, kw2, kb2, ku2 = jax.random.split(key, 8)

    x = jax.random.normal(kx, (S, B, H), dtype=jnp.float32)
    W = jax.random.normal(kw, (H, A), dtype=jnp.float32)
    b = jax.random.normal(kb, (A,), dtype=jnp.float32)
    u = jax.random.normal(ku, (A, 1), dtype=jnp.float32)

    ref = att_layer2_ref(x, W, b, u)

    # Multi-tile S reduction (20 = 2*8 + 4-row tail): exercises online softmax
    # accumulation and the in-kernel sequence tail mask.
    out_small = jax.block_until_ready(att_layer2(x, W, b, u, block_s=8))
    assert out_small.shape == (B, H)
    err = float(jnp.max(jnp.abs(out_small - ref)))
    assert jnp.allclose(out_small, ref, atol=3e-5, rtol=3e-5), err

    # Default tiling: single S tile per batch element.
    out_default = jax.block_until_ready(att_layer2(x, W, b, u))
    assert jnp.allclose(out_default, ref, atol=3e-5, rtol=3e-5)

    # Odd, unaligned dims close to the original module (hiddenDim=3): shows
    # that no HBM-side padding is needed for correctness.
    S2, B2, H2, A2 = 9, 2, 3, 5
    x2 = jax.random.normal(kx2, (S2, B2, H2), dtype=jnp.float32)
    W2 = jax.random.normal(kw2, (H2, A2), dtype=jnp.float32)
    b2 = jax.random.normal(kb2, (A2,), dtype=jnp.float32)
    u2 = jax.random.normal(ku2, (A2, 1), dtype=jnp.float32)
    ref2 = att_layer2_ref(x2, W2, b2, u2)
    out2 = jax.block_until_ready(att_layer2(x2, W2, b2, u2, block_s=8))
    assert jnp.allclose(out2, ref2, atol=3e-5, rtol=3e-5)

    print("KERNEL_OK")
</pallas_src>

<mosaic_0001>
module attributes {stable_mosaic.version = 11 : i64} {
  func.func @kernel(%arg0: i32, %arg1: i32, %arg2: memref<8x1x1x32xf32, #tpu.memory_space<vmem>>, %arg3: memref<16x32xf32, #tpu.memory_space<vmem>>, %arg4: memref<16x1xf32, #tpu.memory_space<vmem>>, %arg5: memref<16x1xf32, #tpu.memory_space<vmem>>, %arg6: memref<1x1x32xf32, #tpu.memory_space<vmem>>, %arg7: memref<1x1xf32, #tpu.memory_space<vmem>>, %arg8: memref<1x1xf32, #tpu.memory_space<vmem>>, %arg9: memref<1x32xf32, #tpu.memory_space<vmem>>) attributes {dimension_semantics = [#tpu.dimension_semantics<parallel>, #tpu.dimension_semantics<arbitrary>], iteration_bounds = array<i64: 4, 3>, scalar_prefetch = 0 : i64, scratch_operands = 3 : i64, tpu.core_type = #tpu.core_type<tc>, window_params = [{transform_indices = @transform_0, window_bounds = array<i64: 8, 1, 1, 32>}, {pipeline_mode = #tpu.pipeline_mode<synchronous>, transform_indices = @transform_1, window_bounds = array<i64: 16, 32>}, {pipeline_mode = #tpu.pipeline_mode<synchronous>, transform_indices = @transform_2, window_bounds = array<i64: 16, 1>}, {pipeline_mode = #tpu.pipeline_mode<synchronous>, transform_indices = @transform_3, window_bounds = array<i64: 16, 1>}, {transform_indices = @transform_4, window_bounds = array<i64: 1, 1, 32>}]} {
    %c0_i32 = arith.constant 0 : i32
    %0 = arith.cmpi eq, %arg1, %c0_i32 : i32
    %1 = arith.extui %0 : i1 to i32
    %c0_i32_0 = arith.constant 0 : i32
    %2 = arith.cmpi ne, %1, %c0_i32_0 : i32
    scf.if %2 {
      %cst_31 = arith.constant 0xFF800000 : f32
      %59 = vector.broadcast %cst_31 : f32 to vector<1x1xf32>
      %c0_32 = arith.constant 0 : index
      %c0_33 = arith.constant 0 : index
      %60 = vector.load %arg7[%c0_32, %c0_33] : memref<1x1xf32, #tpu.memory_space<vmem>>, vector<1x1xf32>
      tpu.vector_store %arg7[%c0_32, %c0_33], %59 {strides = array<i32>} : memref<1x1xf32, #tpu.memory_space<vmem>>, vector<1x1xf32>,
      %cst_34 = arith.constant 0.000000e+00 : f32
      %61 = vector.broadcast %cst_34 : f32 to vector<1x1xf32>
      %c0_35 = arith.constant 0 : index
      %c0_36 = arith.constant 0 : index
      %62 = vector.load %arg8[%c0_35, %c0_36] : memref<1x1xf32, #tpu.memory_space<vmem>>, vector<1x1xf32>
      tpu.vector_store %arg8[%c0_35, %c0_36], %61 {strides = array<i32>} : memref<1x1xf32, #tpu.memory_space<vmem>>, vector<1x1xf32>,
      %cst_37 = arith.constant 0.000000e+00 : f32
      %63 = vector.broadcast %cst_37 : f32 to vector<1x32xf32>
      %c0_38 = arith.constant 0 : index
      %c0_39 = arith.constant 0 : index
      %64 = vector.load %arg9[%c0_38, %c0_39] : memref<1x32xf32, #tpu.memory_space<vmem>>, vector<1x32xf32>
      tpu.vector_store %arg9[%c0_38, %c0_39], %63 {strides = array<i32>} : memref<1x32xf32, #tpu.memory_space<vmem>>, vector<1x32xf32>,
    } else {
    }
    %c0 = arith.constant 0 : index
    %c0_1 = arith.constant 0 : index
    %c0_2 = arith.constant 0 : index
    %c0_3 = arith.constant 0 : index
    %3 = vector.load %arg2[%c0, %c0_1, %c0_2, %c0_3] : memref<8x1x1x32xf32, #tpu.memory_space<vmem>>, vector<8x1x1x32xf32>
    %4 = vector.shape_cast %3 : vector<8x1x1x32xf32> to vector<8x32xf32>
    %c8_i32 = arith.constant 8 : i32
    %5 = arith.muli %arg1, %c8_i32 : i32
    %6 = tpu.iota {dimensions = array<i32: 0>} : vector<8x1xi32>
    %7 = vector.broadcast %5 : i32 to vector<8x1xi32>
    %8 = arith.addi %7, %6 : vector<8x1xi32>
    %c20_i32 = arith.constant 20 : i32
    %9 = vector.broadcast %c20_i32 : i32 to vector<8x1xi32>
    %10 = arith.cmpi slt, %8, %9 : vector<8x1xi32>
    %cst = arith.constant 0.000000e+00 : f32
    %11 = vector.broadcast %cst : f32 to vector<8x32xf32>
    %12 = vector.shape_cast %10 : vector<8x1xi1> to vector<8x1xi1>
    %13 = vector.broadcast %12 : vector<8x1xi1> to vector<8x32xi1>
    %14 = arith.select %13, %4, %11 : vector<8x32xi1>, vector<8x32xf32>
    %c0_4 = arith.constant 0 : index
    %c0_5 = arith.constant 0 : index
    %15 = vector.load %arg3[%c0_4, %c0_5] : memref<16x32xf32, #tpu.memory_space<vmem>>, vector<16x32xf32>
    %cst_6 = arith.constant dense<0.000000e+00> : vector<16x8xf32>
    %16 = tpu.matmul %15, %14, %cst_6 {dimension_numbers = #tpu.dot_dimension_numbers<[1], [1], [0], [0], [0, 0, 1, 0], [], []>} : vector<16x32xf32>, vector<8x32xf32>, vector<16x8xf32> -> vector<16x8xf32>
    %c0_7 = arith.constant 0 : index
    %c0_8 = arith.constant 0 : index
    %17 = vector.load %arg4[%c0_7, %c0_8] : memref<16x1xf32, #tpu.memory_space<vmem>>, vector<16x1xf32>
    %18 = vector.broadcast %17 : vector<16x1xf32> to vector<16x8xf32>
    %19 = arith.addf %16, %18 : vector<16x8xf32>
    %20 = math.tanh %19 : vector<16x8xf32>
    %c0_9 = arith.constant 0 : index
    %c0_10 = arith.constant 0 : index
    %21 = vector.load %arg5[%c0_9, %c0_10] : memref<16x1xf32, #tpu.memory_space<vmem>>, vector<16x1xf32>
    %22 = vector.broadcast %21 : vector<16x1xf32> to vector<16x8xf32>
    %23 = arith.mulf %20, %22 : vector<16x8xf32>
    %cst_11 = arith.constant dense<0.000000e+00> : vector<8xf32>
    %24 = vector.multi_reduction <add>, %23, %cst_11 [0] : vector<16x8xf32> to vector<8xf32>
    %25 = vector.shape_cast %24 : vector<8xf32> to vector<1x8xf32>
    %c8_i32_12 = arith.constant 8 : i32
    %26 = arith.muli %arg1, %c8_i32_12 : i32
    %27 = tpu.iota {dimensions = array<i32: 1>} : vector<1x8xi32>
    %28 = vector.broadcast %26 : i32 to vector<1x8xi32>
    %29 = arith.addi %28, %27 : vector<1x8xi32>
    %c20_i32_13 = arith.constant 20 : i32
    %30 = vector.broadcast %c20_i32_13 : i32 to vector<1x8xi32>
    %31 = arith.cmpi slt, %29, %30 : vector<1x8xi32>
    %cst_14 = arith.constant 0xFF800000 : f32
    %32 = vector.broadcast %cst_14 : f32 to vector<1x8xf32>
    %33 = arith.select %31, %25, %32 : vector<1x8xi1>, vector<1x8xf32>
    %c0_15 = arith.constant 0 : index
    %c0_16 = arith.constant 0 : index
    %34 = vector.load %arg7[%c0_15, %c0_16] : memref<1x1xf32, #tpu.memory_space<vmem>>, vector<1x1xf32>
    %cst_17 = arith.constant dense<0xFF800000> : vector<1xf32>
    %35 = vector.multi_reduction <maximumf>, %33, %cst_17 [1] : vector<1x8xf32> to vector<1xf32>
    %36 = vector.shape_cast %35 : vector<1xf32> to vector<1x1xf32>
    %37 = arith.maximumf %34, %36 : vector<1x1xf32>
    %38 = arith.subf %34, %37 : vector<1x1xf32>
    %39 = math.exp %38 : vector<1x1xf32>
    %40 = vector.broadcast %37 : vector<1x1xf32> to vector<1x8xf32>
    %41 = arith.subf %33, %40 : vector<1x8xf32>
    %42 = math.exp %41 : vector<1x8xf32>
    %c0_18 = arith.constant 0 : index
    %c0_19 = arith.constant 0 : index
    %43 = vector.load %arg8[%c0_18, %c0_19] : memref<1x1xf32, #tpu.memory_space<vmem>>, vector<1x1xf32>
    %44 = arith.mulf %39, %43 : vector<1x1xf32>
    %cst_20 = arith.constant dense<0.000000e+00> : vector<1xf32>
    %45 = vector.multi_reduction <add>, %42, %cst_20 [1] : vector<1x8xf32> to vector<1xf32>
    %46 = vector.shape_cast %45 : vector<1xf32> to vector<1x1xf32>
    %47 = arith.addf %44, %46 : vector<1x1xf32>
    %c0_21 = arith.constant 0 : index
    %c0_22 = arith.constant 0 : index
    %48 = vector.load %arg8[%c0_21, %c0_22] : memref<1x1xf32, #tpu.memory_space<vmem>>, vector<1x1xf32>
    tpu.vector_store %arg8[%c0_21, %c0_22], %47 {strides = array<i32>} : memref<1x1xf32, #tpu.memory_space<vmem>>, vector<1x1xf32>,
    %c0_23 = arith.constant 0 : index
    %c0_24 = arith.constant 0 : index
    %49 = vector.load %arg9[%c0_23, %c0_24] : memref<1x32xf32, #tpu.memory_space<vmem>>, vector<1x32xf32>
    %50 = vector.broadcast %39 : vector<1x1xf32> to vector<1x32xf32>
    %51 = arith.mulf %50, %49 : vector<1x32xf32>
    %cst_25 = arith.constant dense<0.000000e+00> : vector<1x32xf32>
    %52 = tpu.matmul %42, %14, %cst_25 {dimension_numbers = #tpu.dot_dimension_numbers<[1], [0], [0], [1], [0, 0, 1, 1], [], []>} : vector<1x8xf32>, vector<8x32xf32>, vector<1x32xf32> -> vector<1x32xf32>
    %53 = arith.addf %51, %52 : vector<1x32xf32>
    %c0_26 = arith.constant 0 : index
    %c0_27 = arith.constant 0 : index
    %54 = vector.load %arg9[%c0_26, %c0_27] : memref<1x32xf32, #tpu.memory_space<vmem>>, vector<1x32xf32>
    tpu.vector_store %arg9[%c0_26, %c0_27], %53 {strides = array<i32>} : memref<1x32xf32, #tpu.memory_space<vmem>>, vector<1x32xf32>,
    %c0_28 = arith.constant 0 : index
    %c0_29 = arith.constant 0 : index
    %55 = vector.load %arg7[%c0_28, %c0_29] : memref<1x1xf32, #tpu.memory_space<vmem>>, vector<1x1xf32>
    tpu.vector_store %arg7[%c0_28, %c0_29], %37 {strides = array<i32>} : memref<1x1xf32, #tpu.memory_space<vmem>>, vector<1x1xf32>,
    %c2_i32 = arith.constant 2 : i32
    %56 = arith.cmpi eq, %arg1, %c2_i32 : i32
    %57 = arith.extui %56 : i1 to i32
    %c0_i32_30 = arith.constant 0 : i32
    %58 = arith.cmpi ne, %57, %c0_i32_30 : i32
    scf.if %58 {
      %c0_31 = arith.constant 0 : index
      %c0_32 = arith.constant 0 : index
      %59 = vector.load %arg9[%c0_31, %c0_32] : memref<1x32xf32, #tpu.memory_space<vmem>>, vector<1x32xf32>
      %c0_33 = arith.constant 0 : index
      %c0_34 = arith.constant 0 : index
      %60 = vector.load %arg8[%c0_33, %c0_34] : memref<1x1xf32, #tpu.memory_space<vmem>>, vector<1x1xf32>
      %61 = vector.broadcast %60 : vector<1x1xf32> to vector<1x32xf32>
      %62 = arith.divf %59, %61 : vector<1x32xf32>
      %c0_35 = arith.constant 0 : index
      %c0_36 = arith.constant 0 : index
      %c0_37 = arith.constant 0 : index
      %63 = vector.load %arg6[%c0_35, %c0_36, %c0_37] : memref<1x1x32xf32, #tpu.memory_space<vmem>>, vector<1x1x32xf32>
      %64 = vector.shape_cast %63 : vector<1x1x32xf32> to vector<1x32xf32>
      %65 = vector.shape_cast %62 : vector<1x32xf32> to vector<1x1x32xf32>
      tpu.vector_store %arg6[%c0_35, %c0_36, %c0_37], %65 {strides = array<i32>} : memref<1x1x32xf32, #tpu.memory_space<vmem>>, vector<1x1x32xf32>,
    } else {
    }
    return
  }
  func.func @transform_0(%arg0: i32, %arg1: i32) -> (i32, i32, i32, i32) {
    %c0_i32 = arith.constant 0 : i32
    %c0_i32_0 = arith.constant 0 : i32
    %c0_i32_1 = arith.constant 0 : i32
    return %arg1, %arg0, %c0_i32, %c0_i32_0 : i32, i32, i32, i32
  }
  func.func @transform_1(%arg0: i32, %arg1: i32) -> (i32, i32) {
    %c0_i32 = arith.constant 0 : i32
    %c0_i32_0 = arith.constant 0 : i32
    %c0_i32_1 = arith.constant 0 : i32
    return %c0_i32, %c0_i32_0 : i32, i32
  }
  func.func @transform_2(%arg0: i32, %arg1: i32) -> (i32, i32) {
    %c0_i32 = arith.constant 0 : i32
    %c0_i32_0 = arith.constant 0 : i32
    %c0_i32_1 = arith.constant 0 : i32
    return %c0_i32, %c0_i32_0 : i32, i32
  }
  func.func @transform_3(%arg0: i32, %arg1: i32) -> (i32, i32) {
    %c0_i32 = arith.constant 0 : i32
    %c0_i32_0 = arith.constant 0 : i32
    %c0_i32_1 = arith.constant 0 : i32
    return %c0_i32, %c0_i32_0 : i32, i32
  }
  func.func @transform_4(%arg0: i32, %arg1: i32) -> (i32, i32, i32) {
    %c0_i32 = arith.constant 0 : i32
    %c0_i32_0 = arith.constant 0 : i32
    %c0_i32_1 = arith.constant 0 : i32
    return %arg0, %c0_i32, %c0_i32_0 : i32, i32, i32
  }
}

</mosaic_0001>

<bundles_post_ra>
// kernel: tpu_custom_call.1
= control target key start
LH: loop header
LB: loop body
LE: loop exit
PB: predicated region body
PF: predicated region fallthrough
CT: control target
= control target key end

     0   :  { %9 = vsyncpa [#allocation6], 0  ;;  %s1258_s0 = inlined_call_operand.hbm [shape: f32[20,4,1,32], index: 0, kind: input, shape index: {}]   ;;  %s1259_s1 = inlined_call_operand.vmem [shape: f32[16,32], index: 1, kind: input, shape index: {}]   ;;  %s1260_s2 = inlined_call_operand.vmem [shape: f32[16,1], index: 2, kind: input, shape index: {}]   ;;  %s1261_s3 = inlined_call_operand.vmem [shape: f32[16,1], index: 3, kind: input, shape index: {}]   ;;  %s1262_s4 = inlined_call_operand.hbm [shape: f32[4,1,32], index: 4, kind: output, shape index: {}]  }
   0x1   :  { %11 = vsyncpa [#allocation6 + $0x1], 0 }
   0x2   :  { %12 = vsyncpa [#allocation7], 0 }
   0x3   :  { %14 = vsyncpa [#allocation7 + $0x1], 0  ;;  %s1024_s15 = smov 0   ;;  %s1026_s16 = smov 0  }
   0x4   :  { %s1028_s17 = smov 0   ;;  %s1030_s18 = smov 0  }
   0x5   :  { %s1032_s19 = smov 0   ;;  %s1034_s20 = smov 0  }
   0x6   :  { %s1036_s21 = smov 0   ;;  %s1038_s22 = smov 0  }
   0x7   :  { %s1040_s23 = smov 0   ;;  %s1042_s24 = smov 0  }
   0x8   :  { %s1044_s25 = smov 0  }
   0x9 LB: > { %1266 = sst [smem:[#allocation11_spill]] %s965_s20  ;;  %s681_s26 = sadd.s32 4294967295, %s985_s25   ;;  %s985_s25 = sphi %s1044_s25, %s20_s25   ;;  %s981_s24 = sphi %s1042_s24, %s1288_s24   ;;  %s977_s23 = sphi %s1040_s23, %s1287_s23   ;;  %s973_s22 = sphi %s1038_s22, %s1286_s22   ;;  %s969_s21 = sphi %s1036_s21, %s1285_s21   ;;  %s965_s20 = sphi %s1034_s20, %s1277_s20   ;;  %s961_s19 = sphi %s1032_s19, %s1284_s19   ;;  %s957_s18 = sphi %s1030_s18, %s1283_s18   ;;  %s953_s17 = sphi %s1028_s17, %s1282_s17   ;;  %s949_s16 = sphi %s1026_s16, %s1281_s16   ;;  %s945_s15 = sphi %s1024_s15, %s1280_s15  }
   0xa   : > { %s682_s27 = sadd.s32 4294967294, %s985_s25   ;;  %s29_s28 = sadd.s32 1, %s977_s23 }
   0xb   : > { %s32_s29 = sadd.s32 1, %s981_s24  ;;  %p30_p0 = scmp.ge.s32.totalorder %s29_s28, 3 }
   0xc   : > { %s41_s30 = sadd.s32 1, %s965_s20  ;;  %p48_p1 = scmp.ne.s32.totalorder %s965_s20, %s961_s19 }
   0xd   : > { %p49_p2 = scmp.eq.s32.totalorder %s985_s25, 0  ;;  %s1290_s28 = smov (%p30_p0, %s29_s28), 0 }
   0xe   : > { %1267 = sst [smem:[#allocation12_spill]] %s1290_s28  ;;  %s1292_s29 = smov (!%p30_p0, %s32_s29), %s981_s24 }
   0xf   : > { %s36_s5 = ssub.s32 %s977_s23, %s1290_s28  ;;  %p1090_p3 = por %p49_p2, %p48_p1 }
  0x10   : > { %p34_p4 = scmp.ge.s32.totalorder %s1292_s29, 4  ;;  %p54_p5 = scmp.ne.s32.totalorder %s961_s19, %s957_s18 }
  0x11   : > { %p55_p6 = scmp.eq.s32.totalorder %s681_s26, 0  ;;  %s130_s7 = sadd.s32 1, %s953_s17 }
  0x12   : > { %s1294_s29 = smov (%p34_p4, %s1292_s29), 0  ;;  %p140_p8 = scmp.ne.s32.totalorder %s953_s17, %s949_s16 }
  0x13   : > { %1269 = sst [smem:[#allocation13_spill]] %s1294_s29  ;;  %p1098_p7 = por %p55_p6, %p54_p5 }
  0x14   : > { %s37_s9 = ssub.s32 %s981_s24, %s1294_s29  ;;  %p141_p9 = scmp.eq.s32.totalorder %s681_s26, 11 }
  0x15   : > { %s38_s10 = sor.u32 %s37_s9, %s36_s5  ;;  %p128_p10 = scmp.eq.s32.totalorder %s37_s9, 0 }
  0x16   : > { %p39_p11 = scmp.eq.s32.totalorder %s38_s10, 0  ;;  %p1106_p12 = por %p141_p9, %p140_p8 }
  0x17   : > { %s1111_s12 = scalar_select %p128_p10, %s953_s17, %s130_s7  }
  0x18   : > { %s1114_s13 = scalar_select %p39_p11, %s965_s20, %s41_s30  }
  0x19   : > { %1272 = sst [smem:[#allocation14_spill]] %s1111_s12  ;;  %p146_p13 = scmp.ne.s32.totalorder %s949_s16, %s945_s15 }
  0x1a   : > { %1273 = sst [smem:[#allocation15_spill]] %s1114_s13  ;;  %p147_p0 = scmp.eq.s32.totalorder %s682_s27, 11 }
  0x1b   : > { %p684_p2 = scmp.ge.s32.totalorder %s985_s25, 12 }
  0x1c   : > { %p1118_p1 = por %p147_p0, %p146_p13 }
  0x1d   : > { %172 = sbr.rel (%p684_p2) target bundleno = 59 (0x3b), region = 28 }
  0x22   : > { %175 = sbr.rel (!%p1090_p3) target bundleno = 59 (0x3b), region = 32  ;;  %s176_s18 = sand.u32 (%p1090_p3), 1, %s965_s20  }
  0x23   : > { %s686_s26 = sshll.u32 (%p1090_p3), %s977_s23, 3  ;;  %s685_s5 = sshll.u32 (%p1090_p3), %s176_s18, 3 }
  0x24   : > { %s182_s7 = ssub.s32 (%p1090_p3), 20, %s686_s26  ;;  %s1130_s9 = scalar_lea.sflag (%p1090_p3), [#allocation6], %s176_s18 }
  0x25   : > { %p183_p4 = scmp.lt.s32.totalorder (%p1090_p3), %s182_s7, 8  ;;  %s180_s10 = scalar_lea.vmem (%p1090_p3), [#allocation5], %s685_s5 }
  0x27   : > { %s1296_s7 = smov (!%p183_p4, %s182_s7), 8 }
  0x28   : > { %s1127_s30 = sshll.u32 %s1296_s7, 4 }
  0x29   : > { %s187_s27 = ssub.s32 128, %s1127_s30 }
  0x2a   : > { %188 = vsyncadd %s1130_s9, %s187_s27  ;;  %p688_p3 = scmp.ne.s32.totalorder %s1127_s30, 0  ;;  %s704_s6 = sshll.u32 %s977_s23, 5 }
  0x2b   : > { %s191_s29 = sadd.s32 %s981_s24, %s704_s6  ;;  %s194_s26 = sshll.u32 %s180_s10, 4  ;;  %s195_s26 = int_to_ptr.vmem [resolvable:$true] %s194_s26 }
  0x2c   : > { %s690_s28 = sshll.u32 %s191_s29, 4  ;;  %s851_s18 = scalar_lea.vmem %s195_s26, %s1127_s30 }
  0x2d   : > { %s193_s20 = scalar_lea.hbm %s1258_s0, %s690_s28  ;;  %p852_p5 = scmp.ne.s32.totalorder %s195_s26, %s851_s18 }
  0x2e   : > { %s987_s5 = smov [#allocation5]  }
  0x2f   : > { %p853_p6 = pnand %p852_p5, %p688_p3  ;;  %s855_s27 = sshll.u32 %s987_s5, 4  ;;  %s856_s27 = int_to_ptr.vmem [resolvable:$false] %s855_s27 }
  0x30   : > { %s857_s12 = scalar_lea.vmem %s856_s27, 256  ;;  %p858_p9 = scmp.lt.s32.totalorder %s195_s26, %s856_s27 }
  0x31   : > { %p854_p8 = pneg %p853_p6  ;;  %p859_p10 = scmp.lt.s32.totalorder %s857_s12, %s851_s18 }
  0x33   : > { %p860_p11 = por %p859_p10, %p858_p9 }
  0x35   : > { %p861_p13 = pnand %p860_p11, %p854_p8 }
  0x37   : > { %864 = shalt.err (!%p861_p13)
}
  0x38   : > { %s988_s29 = smov 64   ;;  %s989_s13 = smov 16  }
  0x39   : > { %s990_s28 = smov 1  }
  0x3a   : > { %200 = dma.hbm_to_vmem [thread:$0]  (%p688_p3), %s193_s20, %s1127_s30, %s195_s26, %s1130_s9, %s988_s29, %s989_s13, %s990_s28  }
  0x3b PF: > { %p691_p0 = scmp.ge.s32.totalorder %s985_s25, 1  ;;  %p202_p2 = scmp.lt.s32.totalorder %s985_s25, 13 }
  0x3d   : > { %p203_p4 = pnand %p691_p0, %p202_p2 }
  0x3e   : > { %s208_s12 = sand.u32 (!%p203_p4), 1, %s961_s19  }
  0x3f   : > { %206 = sbr.rel (%p203_p4) target bundleno = 980 (0x3d4), region = 36  ;;  %s692_s10 = sshll.u32 (!%p203_p4), %s208_s12, 3 }
  0x40   : > { %s209_s6 = scalar_lea.sflag (!%p203_p4), [#allocation6], %s208_s12  ;;  %s212_s7 = scalar_lea.vmem (!%p203_p4), [#allocation5], %s692_s10 }
  0x44   : > { %936 = dma.done.wait (%p1098_p7), %s209_s6, 128  }
  0x45   : > { %938 = vsyncadd (%p1098_p7), %s209_s6, 4294967168  ;;  %s234_s20 = sand.u32 1, %s949_s16   ;;  %p693_p3 = scmp.ne.s32.totalorder %s969_s21, 0 }
  0x46   : > { %s1156_s30 = scalar_lea.vmem [#allocation8], %s234_s20 }
  0x47   : > { %244 = sbr.rel (%p693_p3) target bundleno = 79 (0x4f), region = 44 }
  0x4c   : > { %vm245_vm0 = vcmask 0   ;;  %vm248_vm1 = vcmask 253952   ;;  %v991_v0 = vmov -inf   ;;  %v992_v1 = vmov 0.0  }
  0x4d   : > { %246 = vst.msk [vmem:[#allocation2] sm:$0x1] %vm245_vm0, %v991_v0  ;;  %247 = vst.msk [vmem:[#allocation3] sm:$0x1] %vm245_vm0, %v992_v1 }
  0x4e   : > { %249 = vst.msk [vmem:[#allocation4] sm:$0x1] %vm248_vm1, %v992_v1 }
  0x4f PF: > { %v250_v2 = vld [vmem:[%s212_s7] sm:$0x1]  ;;  %v251_v3 = vld [vmem:[%s212_s7 + $0x1] sm:$0x1]  ;;  %v259_v4 = vlaneseq  ;;  %v252_v5 = vld [vmem:[%s212_s7 + $0x2] sm:$0x1] }
  0x50   : > { %v253_v6 = vld [vmem:[%s212_s7 + $0x3] sm:$0x1]  ;;  %v254_v7 = vld [vmem:[%s212_s7 + $0x4] sm:$0x1]  ;;  %v255_v8 = vld [vmem:[%s212_s7 + $0x5] sm:$0x1]  ;;  %v274_v17 = vcombine.low %v250_v2, %v251_v3 }
  0x51   : > { %v256_v9 = vld [vmem:[%s212_s7 + $0x6] sm:$0x1]  ;;  %v257_v10 = vld [vmem:[%s212_s7 + $0x7] sm:$0x1]  ;;  %vm339_vm2 = vcmask 261120   ;;  %v325_v11 = vld [vmem:[%s1259_s1] sm:$0xff]  ;;  %v275_v19 = vcombine.low %v252_v5, %v253_v6  ;;  %v276_v20 = vcombine.low %v254_v7, %v255_v8 }
  0x52   : > { %v327_v12 = vld [vmem:[%s1260_s2] sm:$0xff]  ;;  %v1166_v13 = vshrl.u32 %v259_v4, 7  ;;  %v993_v14 = vmov 1966171168   ;;  %712 = vmatprep.mubr.msk.f32.mxu0 %vm339_vm2, %v325_v11  ;;  %s694_s29 = sshll.u32 %s969_s21, 3  ;;  %v994_v18 = vmov 0   ;;  %v277_v21 = vcombine.low %v256_v9, %v257_v10 }
  0x53   : > { %v279_v15 = vunpack.c.l.s4 %v993_v14  ;;  %v426_v16 = vld [vmem:[%s1261_s3] sm:$0xff]  ;;  %826 = vset.pattern.permute.xlu0 %v994_v18  ;;  %827 = vset.pattern.permute.xlu1 %v994_v18  ;;  %v328_v23 = vld [vmem:[%s1260_s2 + $0x8] sm:$0xff]  ;;  %v261_v24 = vstv %s694_s29  ;;  %vm440_vm4 = vcmask 64512   ;;  %v451_v55 = vand.u32 127, %v259_v4  ;;  %p700_p7 = scmp.ne.s32.totalorder %s969_s21, 2 }
  0x54   : > { %331 = vperm.xlu0 %826, %v327_v12   ;;  %430 = vperm.xlu1 %827, %v426_v16   ;;  %v427_v26 = vld [vmem:[%s1261_s3 + $0x8] sm:$0xff]  ;;  %v262_v31 = vadd.s32 %v261_v24, %v1166_v13  ;;  %v455_v0 = vld [vmem:[#allocation2] sm:$0x1]  ;;  %vm481_vm6 = vcmask 0   ;;  %v995_v5 = vmov 0.0   ;;  %vm996_vm7 = vmmov 0  }
  0x55   : > { %v280_v22 = vunpack.c.0.s8 %v279_v15  ;;  %v326_v38 = vld [vmem:[%s1259_s1 + $0x8] sm:$0xff]  ;;  %v452_v58 = vadd.s32 %v451_v55, %v261_v24  ;;  %715 = vmatprep.subr.mxu1 %v995_v5  ;;  %717 = vmatprep.mubr.msk.f32.mxu1 %vm996_vm7, %v995_v5  ;;  %v470_v7 = vsub.s32 0, %v1166_v13  ;;  %v475_v15 = vld [vmem:[#allocation3] sm:$0x1]  ;;  %vm568_vm8 = vcmask 253952  }
  0x56   : > { %vm263_vm3 = vcmp.lt.s32.totalorder %v262_v31, 20 }
  0x57   : > { %v283_v25 = vsub.s32 %v280_v22, %v1166_v13  ;;  %vm453_vm5 = vcmp.lt.s32.totalorder %v452_v58, 20  ;;  %v483_v13 = vld [vmem:[#allocation4] sm:$0x1] }
  0x58   : > { %336 = vperm.xlu0 %826, %v328_v23   ;;  %435 = vperm.xlu1 %827, %v427_v26  }
  0x59   : > { %v284_v27 = vrot.slane %v274_v17, %v283_v25  ;;  %v291_v28 = vrot.slane %v275_v19, %v283_v25  ;;  %v298_v29 = vrot.slane %v276_v20, %v283_v25  ;;  %v305_v30 = vrot.slane %v277_v21, %v283_v25 }
  0x5b   : > { %v306_v32 = vcombine.low %v284_v27, %v291_v28  ;;  %v307_v33 = vcombine.low %v298_v29, %v305_v30 }
  0x5d   : > { %v314_v34 = vrot.slane %v306_v32, %v283_v25  ;;  %v321_v35 = vrot.slane %v307_v33, %v283_v25 }
  0x5f   : > { %v322_v36 = vcombine.low %v314_v34, %v321_v35 }
  0x61   : > { %v324_v37 = vsel %vm263_vm3, %v322_v36, 0.0  ;;  %716 = vmatpush3.msk.msra.mxu1 %vm263_vm3, %v322_v36 }
  0x62   : > { %710 = vmatprep.subr.msk.mxu0 %vm339_vm2, %v324_v37 }
  0x63   : > { %711 = vmatpush3.xpose.msk.msra.mxu0 %vm339_vm2, %v324_v37 }
  0x66   : > { %713 = vmatmul.mubr.msk.f32.vlgmr.msra.gmra.mxu0 %vm339_vm2, %v326_v38 }
  0xcf   : > { %v332_v39 = vpop.permute.xlu0 %331  ;;  %v431_v45 = vpop.permute.xlu1 %430 }
  0xd3   : > { %v337_v40 = vpop.permute.xlu0 %336  ;;  %v436_v47 = vpop.permute.xlu1 %435 }
 0x126   : > { %v714_v41 = vpop.f32.mrf.mxu0 }
 0x127   : > { %v421_v42 = vadd.f32 %v714_v41, %v337_v40 }
 0x128   : > { %v415_v43 = vpop.f32.mrf.mxu0 }
 0x129   : > { %828 = vtanh.f32 %v421_v42  ;;  %v416_v44 = vadd.f32 %v415_v43, %v332_v39 }
 0x12b   : > { %830 = vtanh.f32 %v416_v44 }
 0x136   : > { %v829_v46 = vpop.eup %828 }
 0x137   : > { %v439_v48 = vmul.f32 %v829_v46, %v436_v47 }
 0x138   : > { %v831_v49 = vpop.eup %830 }
 0x139   : > { %v438_v50 = vmul.f32 %v831_v49, %v431_v45  ;;  %v442_v52 = vsel %vm440_vm4, %v439_v48, 0.0 }
 0x13b   : > { %v441_v51 = vsel %vm440_vm4, %v438_v50, 0.0 }
 0x13c   : > { %v443_v53 = vadd.f32 %v442_v52, %v441_v51 }
 0x13e   : > { %v444_v54 = vrot.slane %v443_v53, 4 }
 0x140   : > { %v445_v56 = vadd.f32 %v444_v54, %v443_v53 }
 0x142   : > { %v446_v57 = vrot.slane %v445_v56, 2 }
 0x144   : > { %v447_v59 = vadd.f32 %v446_v57, %v445_v56 }
 0x146   : > { %v448_v60 = vrot.slane %v447_v59, 1 }
 0x148   : > { %v449_v61 = vadd.f32 %v448_v60, %v447_v59 }
 0x14a   : > { %v454_v62 = vsel %vm453_vm5, %v449_v61, -inf }
 0x14b   : > { %v456_v63 = vsel %vm440_vm4, %v454_v62, -inf }
 0x14c   : > { %457 = vmax.xlane.f32.xlu0 %v456_v63 }
 0x1d5   : > { %v458_v1 = vpop.xlane.xlu0 %457 }
 0x1d6   : > { %v459_v2 = vmax.f32 %v455_v0, %v458_v1 }
 0x1d8   : > { %v460_v3 = vsub.f32 %v455_v0, %v459_v2  ;;  %570 = vst.msk [vmem:[#allocation2] sm:$0x1] %vm481_vm6, %v459_v2  ;;  %465 = vperm.xlu1 %827, %v459_v2  }
 0x1da   : > { %v461_v4 = vmul.f32 1.442695, %v460_v3 }
 0x1dc   : > { %832 = vpow2.f32 %v461_v4 }
 0x1e9   : > { %v833_v6 = vpop.eup %832 }
 0x1ea   : > { %486 = vperm.xlu0 %826, %v833_v6   ;;  %v476_v16 = vmul.f32 %v833_v6, %v475_v15 }
 0x253   : > { %v466_v8 = vpop.permute.xlu1 %465 }
 0x254   : > { %v471_v9 = vrot.slane %v466_v8, %v470_v7 }
 0x256   : > { %v472_v10 = vsub.f32 %v454_v62, %v471_v9 }
 0x258   : > { %v473_v11 = vmul.f32 1.442695, %v472_v10 }
 0x25a   : > { %834 = vpow2.f32 %v473_v11 }
 0x265   : > { %v487_v19 = vpop.permute.xlu0 %486 }
 0x266   : > { %v492_v20 = vrot.slane %v487_v19, %v470_v7 }
 0x267   : > { %v835_v12 = vpop.eup %834 }
 0x268   : > { %718 = vmatmul.mubr.msk.f32.vlgmr.msra.gmra.mxu1 %vm440_vm4, %v835_v12  ;;  %v477_v14 = vsel %vm440_vm4, %v835_v12, 0.0  ;;  %v493_v21 = vmul.f32 %v492_v20, %v483_v13 }
 0x269   : > { %478 = vadd.xlane.f32.xlu1 %v477_v14 }
 0x2f2   : > { %v479_v17 = vpop.xlane.xlu1 %478 }
 0x2f3   : > { %v480_v18 = vadd.f32 %v479_v17, %v476_v16 }
 0x2f5   : > { %482 = vst.msk [vmem:[#allocation3] sm:$0x1] %vm481_vm6, %v480_v18 }
 0x327   : > { %574 = sbr.rel (%p700_p7) target bundleno = 957 (0x3bd), region = 48 }
 0x328   : > { %v563_v22 = vpop.f32.mrf.mxu1 }
 0x329   : > { %v567_v23 = vadd.f32 %v563_v22, %v493_v21 }
 0x32a   : > { %v719_v24 = vpop.f32.mrf.mxu1 }
 0x32b   : > { %569 = vst.msk [vmem:[#allocation4] sm:$0x1] %vm568_vm8, %v567_v23 }
 0x32c   : > { %v576_v25 = vld [vmem:[#allocation3] sm:$0x1]  ;;  %v997_v26 = vmov 0  }
 0x32d   : > { %836 = vset.pattern.permute.xlu0 %v997_v26 }
 0x32e   : > { %579 = vperm.xlu0 %836, %v576_v25  }
 0x332   : > { %v575_v29 = vld [vmem:[#allocation4] sm:$0x1] }
 0x3a9   : > { %v580_v27 = vpop.permute.xlu0 %579 }
 0x3aa   : > { %v585_v28 = vrot.slane %v580_v27, %v470_v7 }
 0x3ac   : > { %837 = vrcp.f32 %v585_v28 }
 0x3b9   : > { %v838_v30 = vpop.eup %837 }
 0x3ba   : > { %v587_v31 = vmul.f32 %v838_v30, %v575_v29 }
 0x3bc   : > { %588 = vst.msk [vmem:[%s1156_s30] sm:$0x1] %vm568_vm8, %v587_v31 }
 0x3bd PF: > { %s701_s21 = sshll.u32 %s973_s22, 4  ;;  %s602_s18 = sshll.u32 %s1156_s30, 4  ;;  %s603_s18 = int_to_ptr.vmem [resolvable:$true] %s602_s18 }
 0x3be   : > { %s600_s26 = scalar_lea.hbm %s1262_s4, %s701_s21  ;;  %s590_s5 = scalar_lea.sflag [#allocation7], %s234_s20 }
 0x3bf   : > { %s865_s27 = scalar_lea.vmem %s603_s18, 16  ;;  %s998_s29 = smov [#allocation8]  }
 0x3c0   : > { %p866_p5 = scmp.ne.s32.totalorder %s603_s18, %s865_s27  ;;  %s869_s13 = sshll.u32 %s998_s29, 4  ;;  %s870_s13 = int_to_ptr.vmem [resolvable:$false] %s869_s13 }
 0x3c1   : > { %s871_s28 = scalar_lea.vmem %s870_s13, 32  ;;  %p872_p9 = scmp.lt.s32.totalorder %s603_s18, %s870_s13 }
 0x3c2   : > { %p867_p6 = pnand %p866_p5, %p1106_p12  ;;  %p873_p10 = scmp.lt.s32.totalorder %s871_s28, %s865_s27 }
 0x3c4   : > { %p868_p8 = pneg %p867_p6  ;;  %p874_p11 = por %p873_p10, %p872_p9 }
 0x3c6   : > { %p875_p13 = pnand %p874_p11, %p868_p8 }
 0x3c8   : > { %878 = shalt.err (!%p875_p13)
}
 0x3c9   : > { %s879_s22 = scalar_lea.hbm %s600_s26, 16  ;;  %s883_s12 = scalar_lea.hbm %s1262_s4, 64 }
 0x3ca   : > { %p880_p0 = scmp.ne.s32.totalorder %s600_s26, %s879_s22  ;;  %p884_p3 = scmp.lt.s32.totalorder %s600_s26, %s1262_s4 }
 0x3cb   : > { %p885_p7 = scmp.lt.s32.totalorder %s883_s12, %s879_s22 }
 0x3cc   : > { %p881_p2 = pnand %p880_p0, %p1106_p12 }
 0x3cd   : > { %p886_p5 = por %p885_p7, %p884_p3 }
 0x3ce   : > { %p882_p4 = pneg %p881_p2 }
 0x3d0   : > { %p887_p6 = pnand %p886_p5, %p882_p4 }
 0x3d2   : > { %890 = shalt.err (!%p887_p6)
}
 0x3d3   : > { %721 = dma.vmem_to_hbm [thread:$0]  (%p1106_p12), %s603_s18, 16, %s600_s26, %s590_s5  }
 0x3d4 PF: > { %p727_p8 = scmp.ge.s32.totalorder %s985_s25, 2  ;;  %s614_s7 = sand.u32 1, %s945_s15  }
 0x3d5   : > { %s615_s21 = scalar_lea.sflag [#allocation7], %s614_s7 }
 0x3d6   : > { %p724_p9 = pnand %p727_p8, %p1118_p1 }
 0x3d8   : > { %p725_p10 = pneg %p724_p9 }
 0x3da   : > { %940 = dma.done.wait (%p725_p10), %s615_s21, 16  }
 0x3db   : > { %942 = vsyncadd (%p725_p10), %s615_s21, 4294967280  ;;  %s20_s25 = sadd.s32 1, %s985_s25   ;;  %s1275_s8 = sld [smem:[#allocation14_spill]] }
 0x3dc   : > { %p17_p11 = scmp.ge.s32.totalorder %s20_s25, 14   ;;  %s1276_s11 = sld [smem:[#allocation11_spill]] }
 0x3dd   : > { %s1277_s20 = sld [smem:[#allocation15_spill]]  ;;  %s1280_s15 = smov %s949_s16 }
 0x3de   : > { %s1278_s9 = sld [smem:[#allocation12_spill]]  ;;  %s1281_s16 = smov %s953_s17 }
 0x3df   : > { %s1279_s26 = sld [smem:[#allocation13_spill]]  ;;  %s1283_s18 = smov %s961_s19 }
 0x3e0   : > { %s1285_s21 = smov %s977_s23  ;;  %s1286_s22 = smov %s981_s24 }
 0x3e1   : > { %s1282_s17 = smov %s1275_s8  ;;  %19 = sbr.rel (!%p17_p11) target bundleno = 9 (0x9), region = 89 }
 0x3e2   : > { %s1284_s19 = smov %s1276_s11 }
 0x3e4   : > { %s1287_s23 = smov %s1278_s9 }
 0x3e5   : > { %s1288_s24 = smov %s1279_s26 }
 0x3e6   :  { %619 = vsyncpa [#allocation6], 1 }
 0x3e7   :  { %621 = vsyncpa [#allocation6 + $0x1], 1 }
 0x3e8   :  { %622 = vsyncpa [#allocation7], 1 }
 0x3e9   :  { %624 = vsyncpa [#allocation7 + $0x1], 1 }

</bundles_post_ra>
